<compile_context>
chip_gen: v7x
topology: tpu7x:2x2x1
jax: 0.10.0
libtpu: 0.0.40
codegen_flags: <defaults>
</compile_context>

<pallas_src>
import functools

import jax
import jax.numpy as jnp
from jax.experimental import pallas as pl
from jax.experimental.pallas import tpu as pltpu


# ----------------------------------------------------------------------------
# Glue: center padding (same semantics as the reference center_padding helper)
# ----------------------------------------------------------------------------
def center_padding(x, multiple):
    # x: (B, C, H, W) -> padded so H, W are multiples of `multiple`, centered.
    _, _, H, W = x.shape
    ph = (-H) % multiple
    pw = (-W) % multiple
    if ph == 0 and pw == 0:
        return x
    top, bot = ph // 2, ph - ph // 2
    left, right = pw // 2, pw - pw // 2
    return jnp.pad(x, ((0, 0), (0, 0), (top, bot), (left, right)))


def _layer_norm_f32(v, g, b, eps):
    # v: (T, D) float32, g/b: (1, D) float32 — statistics kept in f32.
    mu = jnp.mean(v, axis=-1, keepdims=True)
    c = v - mu
    var = jnp.mean(c * c, axis=-1, keepdims=True)
    return c * jax.lax.rsqrt(var + eps) * g + b


# ----------------------------------------------------------------------------
# Kernel 0: patch embedding (Conv2d k=p, s=p as a matmul) + cls token + pos
# ----------------------------------------------------------------------------
def _embed_kernel(p_ref, w_ref, b_ref, cls_ref, pos_ref, out_ref):
    # p_ref: (1, Np, C*p*p) f32, w_ref: (C*p*p, D) bf16, b_ref: (1, D) f32
    # cls_ref: (1, 1, D) f32, pos_ref: (1, Np+1, D) f32, out_ref: (1, Np+1, D) f32
    p = p_ref[0].astype(jnp.bfloat16)
    emb = jnp.dot(p, w_ref[...], preferred_element_type=jnp.float32) + b_ref[...]
    tok = jnp.concatenate([cls_ref[0], emb], axis=0)          # (Np+1, D)
    out_ref[0] = (tok + pos_ref[0]).astype(out_ref.dtype)


def patch_embed_tokens(patches, w, b, cls_tok, pos):
    B, Np, K = patches.shape
    D = w.shape[-1]
    return pl.pallas_call(
        _embed_kernel,
        out_shape=jax.ShapeDtypeStruct((B, Np + 1, D), jnp.float32),
        grid=(B,),
        in_specs=[
            pl.BlockSpec((1, Np, K), lambda bi: (bi, 0, 0)),
            pl.BlockSpec((K, D), lambda bi: (0, 0)),
            pl.BlockSpec((1, D), lambda bi: (0, 0)),
            pl.BlockSpec((1, 1, D), lambda bi: (0, 0, 0)),
            pl.BlockSpec((1, Np + 1, D), lambda bi: (0, 0, 0)),
        ],
        out_specs=pl.BlockSpec((1, Np + 1, D), lambda bi: (bi, 0, 0)),
        compiler_params=pltpu.CompilerParams(dimension_semantics=("parallel",)),
    )(patches, w, b, cls_tok, pos)


# ----------------------------------------------------------------------------
# Kernel 1 (fused attention block), grid = (B, num_heads):
#   h == 0       : ln = LayerNorm1(x) (bf16 scratch);  acc = x + b_proj (f32)
#   every head h : qkv_h = ln @ Wqkv[h] + bqkv[h]
#                  acc  += softmax(q_h k_h^T * s) v_h @ Wproj[h]
#   h == last    : out = acc
# ----------------------------------------------------------------------------
def _attn_fused_kernel(x_ref, g_ref, b_ref, wqkv_ref, bqkv_ref, wproj_ref,
                       bproj_ref, out_ref, ln_ref, acc_ref, *, scale, eps):
    h_id = pl.program_id(1)
    n_heads = pl.num_programs(1)

    @pl.when(h_id == 0)
    def _():
        x = x_ref[0]                                           # (N, D) f32
        ln_ref[...] = _layer_norm_f32(x, g_ref[...], b_ref[...],
                                      eps).astype(ln_ref.dtype)
        # Residual stream + projection bias, added exactly once per batch row.
        acc_ref[...] = x + bproj_ref[...]

    # Per-head QKV projection: (N, D) bf16 @ (D, 3*hd) bf16 -> f32.
    qkv = jnp.dot(ln_ref[...], wqkv_ref[0],
                  preferred_element_type=jnp.float32) + bqkv_ref[0]
    hd = qkv.shape[-1] // 3
    q = (qkv[:, 0:hd] * scale).astype(jnp.bfloat16)            # scale folded in
    k = qkv[:, hd:2 * hd].astype(jnp.bfloat16)
    v = qkv[:, 2 * hd:3 * hd].astype(jnp.bfloat16)

    # q k^T without an explicit transpose: contract the last dims directly.
    s = jax.lax.dot_general(q, k, (((1,), (1,)), ((), ())),
                            preferred_element_type=jnp.float32)  # (N, N) f32
    s = s - jnp.max(s, axis=-1, keepdims=True)
    e = jnp.exp(s)
    # Approximate reciprocal runs on the EUP slot instead of a VALU divide.
    p = e * pl.reciprocal(jnp.sum(e, axis=-1, keepdims=True), approx=True)

    o = jnp.dot(p.astype(jnp.bfloat16), v,
                preferred_element_type=jnp.float32)              # (N, hd)
    acc_ref[...] += jnp.dot(o.astype(jnp.bfloat16), wproj_ref[0],
                            preferred_element_type=jnp.float32)  # (N, D)

    @pl.when(h_id == n_heads - 1)
    def _():
        out_ref[0] = acc_ref[...].astype(out_ref.dtype)


def attention_block(x, blk, num_heads, *, eps=1e-6):
    B, N, D = x.shape
    hd = D // num_heads
    scale = float(hd) ** -0.5

    return pl.pallas_call(
        functools.partial(_attn_fused_kernel, scale=scale, eps=eps),
        out_shape=jax.ShapeDtypeStruct((B, N, D), x.dtype),
        grid=(B, num_heads),
        in_specs=[
            pl.BlockSpec((1, N, D), lambda b, h: (b, 0, 0)),
            pl.BlockSpec((1, D), lambda b, h: (0, 0)),
            pl.BlockSpec((1, D), lambda b, h: (0, 0)),
            pl.BlockSpec((1, D, 3 * hd), lambda b, h: (h, 0, 0)),
            pl.BlockSpec((1, 1, 3 * hd), lambda b, h: (h, 0, 0)),
            pl.BlockSpec((1, hd, D), lambda b, h: (h, 0, 0)),
            pl.BlockSpec((1, D), lambda b, h: (0, 0)),
        ],
        out_specs=pl.BlockSpec((1, N, D), lambda b, h: (b, 0, 0)),
        scratch_shapes=[
            pltpu.VMEM((N, D), jnp.bfloat16),    # LayerNorm'd tokens
            pltpu.VMEM((N, D), jnp.float32),     # residual + per-head acc
        ],
        input_output_aliases={0: 0},     # residual: out buffer reuses x buffer
        compiler_params=pltpu.CompilerParams(
            dimension_semantics=("parallel", "arbitrary")),
    )(x, blk["ln1_g"], blk["ln1_b"], blk["wqkv_hm"], blk["bqkv_hm"],
      blk["wproj_hm"], blk["bproj"])


# ----------------------------------------------------------------------------
# Kernel 2: LN2 + MLP + residual, tiled over tokens (two parallel grid axes)
# ----------------------------------------------------------------------------
def _mlp_kernel(x_ref, g_ref, b_ref, w1_ref, b1_ref, w2_ref, b2_ref, out_ref,
                *, eps):
    x = x_ref[0]                                              # (T, D) f32
    h = _layer_norm_f32(x, g_ref[...], b_ref[...], eps).astype(jnp.bfloat16)
    m = jnp.dot(h, w1_ref[...], preferred_element_type=jnp.float32) + b1_ref[...]
    # TODO(synk): nn.GELU() is the exact erf GELU; tanh approximation used here
    # (erf lowering is not guaranteed on Mosaic; numerical delta is ~1e-3).
    m = jax.nn.gelu(m).astype(jnp.bfloat16)
    m = jnp.dot(m, w2_ref[...], preferred_element_type=jnp.float32) + b2_ref[...]
    out_ref[0] = (x + m).astype(out_ref.dtype)


def _pick_token_tile(n):
    # Largest token tile obeying the (8, 128) block rule; fall back to full N.
    for t in (512, 256, 128, 64, 32, 16, 8):
        if n % t == 0:
            return t
    return n


def mlp_block(x, blk, *, eps=1e-6):
    B, N, D = x.shape
    hidden = blk["wfc1"].shape[-1]
    tn = _pick_token_tile(N)
    return pl.pallas_call(
        functools.partial(_mlp_kernel, eps=eps),
        out_shape=jax.ShapeDtypeStruct((B, N, D), x.dtype),
        grid=(B, N // tn),
        in_specs=[
            pl.BlockSpec((1, tn, D), lambda b, t: (b, t, 0)),
            pl.BlockSpec((1, D), lambda b, t: (0, 0)),
            pl.BlockSpec((1, D), lambda b, t: (0, 0)),
            pl.BlockSpec((D, hidden), lambda b, t: (0, 0)),
            pl.BlockSpec((1, hidden), lambda b, t: (0, 0)),
            pl.BlockSpec((hidden, D), lambda b, t: (0, 0)),
            pl.BlockSpec((1, D), lambda b, t: (0, 0)),
        ],
        out_specs=pl.BlockSpec((1, tn, D), lambda b, t: (b, t, 0)),
        input_output_aliases={0: 0},
        compiler_params=pltpu.CompilerParams(
            dimension_semantics=("parallel", "parallel")),
    )(x, blk["ln2_g"], blk["ln2_b"], blk["wfc1"], blk["bfc1"],
      blk["wfc2"], blk["bfc2"])


# ----------------------------------------------------------------------------
# Parameters (deterministic synthetic init; bf16 weights, head-major layouts)
# ----------------------------------------------------------------------------
def init_params(key, *, C, patch, D, num_heads, n_blocks, n_tokens, mlp_ratio=4):
    K = C * patch * patch
    hidden = mlp_ratio * D
    hd = D // num_heads
    keys = iter(jax.random.split(key, 3 + 4 * n_blocks))

    def nrm(shape, k, s=0.02):
        return (s * jax.random.normal(k, shape)).astype(jnp.float32)

    params = {
        "patch_w": nrm((K, D), next(keys)).astype(jnp.bfloat16),
        "patch_b": jnp.zeros((1, D), jnp.float32),
        "cls_token": nrm((1, 1, D), next(keys)),
        "pos_embed": nrm((1, n_tokens, D), next(keys)),
        "blocks": [],
    }
    # TODO(synk): real DINO interpolates pos_embed when resolution differs from
    # pretraining; synthetic pos_embed is generated at the target token count.
    for _ in range(n_blocks):
        wqkv = nrm((D, 3 * D), next(keys))     # standard (D, 3D) layout ...
        wproj = nrm((D, D), next(keys))
        wfc1 = nrm((D, hidden), next(keys))
        wfc2 = nrm((hidden, D), next(keys))
        # ... rearranged host-side (free) into head-major, bf16 layouts.
        wqkv_hm = (wqkv.reshape(D, 3, num_heads, hd)
                        .transpose(2, 0, 1, 3)
                        .reshape(num_heads, D, 3 * hd)
                        .astype(jnp.bfloat16))
        wproj_hm = wproj.reshape(num_heads, hd, D).astype(jnp.bfloat16)
        blk = {
            "ln1_g": jnp.ones((1, D), jnp.float32),
            "ln1_b": jnp.zeros((1, D), jnp.float32),
            "wqkv_hm": wqkv_hm,
            "bqkv_hm": jnp.zeros((num_heads, 1, 3 * hd), jnp.float32),
            "wproj_hm": wproj_hm,
            "bproj": jnp.zeros((1, D), jnp.float32),
            "ln2_g": jnp.ones((1, D), jnp.float32),
            "ln2_b": jnp.zeros((1, D), jnp.float32),
            "wfc1": wfc1.astype(jnp.bfloat16),
            "bfc1": jnp.zeros((1, hidden), jnp.float32),
            "wfc2": wfc2.astype(jnp.bfloat16),
            "bfc2": jnp.zeros((1, D), jnp.float32),
        }
        params["blocks"].append(blk)
    return params


# ----------------------------------------------------------------------------
# Full DINO_Network.forward equivalent (use_value_facet=False path)
# ----------------------------------------------------------------------------
def dino_forward(x, params, *, patch, num_heads, n_blocks):
    x = center_padding(x, patch)
    B, C, H, W = x.shape
    hh, ww = H // patch, W // patch

    # prepare_tokens: non-overlapping patch extraction (plain-JAX layout glue),
    # then patch-embed matmul + cls token + pos embed fused in one kernel.
    p = x.reshape(B, C, hh, patch, ww, patch)
    p = p.transpose(0, 2, 4, 1, 3, 5).reshape(B, hh * ww, C * patch * patch)
    xt = patch_embed_tokens(p, params["patch_w"], params["patch_b"],
                            params["cls_token"], params["pos_embed"])

    # Transformer blocks (eval mode: dropout / drop_path are identity).
    for blk in params["blocks"][:n_blocks]:
        xt = attention_block(xt, blk, num_heads)
        xt = mlp_block(xt, blk)

    # rearrange(x[:, 1:], 'b (h w) c -> b c h w')
    # TODO(synk): could be fused into the last block's output layout; kept as
    # a single XLA transpose on the final feature map.
    D = xt.shape[-1]
    feats = xt[:, 1:]
    return feats.transpose(0, 2, 1).reshape(B, D, hh, ww)


# ----------------------------------------------------------------------------
# Main
# ----------------------------------------------------------------------------
if __name__ == "__main__":
    # Small synthetic config consistent with the module structure:
    # model ~ 'vitX8' -> output_subsample (patch size) = 8.
    B, C, H, W = 2, 3, 32, 32
    PATCH = 8
    D = 32            # embed dim (out_dim of the synthetic model)
    HEADS = 4
    N_BLOCKS = 2
    N_TOKENS = (H // PATCH) * (W // PATCH) + 1   # patches + cls

    root = jax.random.PRNGKey(0)
    kx, kp = jax.random.split(root)
    x = jax.random.normal(kx, (B, C, H, W), dtype=jnp.float32)
    params = init_params(kp, C=C, patch=PATCH, D=D, num_heads=HEADS,
                         n_blocks=N_BLOCKS, n_tokens=N_TOKENS)

    fwd = jax.jit(functools.partial(dino_forward, patch=PATCH,
                                    num_heads=HEADS, n_blocks=N_BLOCKS))
    out = jax.block_until_ready(fwd(x, params))
    assert out.shape == (B, D, H // PATCH, W // PATCH), out.shape
    print("KERNEL_OK")
</pallas_src>

<mosaic_0001>
module attributes {stable_mosaic.version = 11 : i64} {
  func.func @_embed_kernel(%arg0: i32, %arg1: memref<1x16x192xf32, #tpu.memory_space<vmem>>, %arg2: memref<192x32xbf16, #tpu.memory_space<vmem>>, %arg3: memref<1x32xf32, #tpu.memory_space<vmem>>, %arg4: memref<1x1x32xf32, #tpu.memory_space<vmem>>, %arg5: memref<1x17x32xf32, #tpu.memory_space<vmem>>, %arg6: memref<1x17x32xf32, #tpu.memory_space<vmem>>) attributes {dimension_semantics = [#tpu.dimension_semantics<parallel>], iteration_bounds = array<i64: 2>, scalar_prefetch = 0 : i64, scratch_operands = 0 : i64, tpu.core_type = #tpu.core_type<tc>, window_params = [{transform_indices = @transform_0, window_bounds = array<i64: 1, 16, 192>}, {pipeline_mode = #tpu.pipeline_mode<synchronous>, transform_indices = @transform_1, window_bounds = array<i64: 192, 32>}, {pipeline_mode = #tpu.pipeline_mode<synchronous>, transform_indices = @transform_2, window_bounds = array<i64: 1, 32>}, {pipeline_mode = #tpu.pipeline_mode<synchronous>, transform_indices = @transform_3, window_bounds = array<i64: 1, 1, 32>}, {pipeline_mode = #tpu.pipeline_mode<synchronous>, transform_indices = @transform_4, window_bounds = array<i64: 1, 17, 32>}, {transform_indices = @transform_5, window_bounds = array<i64: 1, 17, 32>}]} {
    %c0 = arith.constant 0 : index
    %c0_0 = arith.constant 0 : index
    %c0_1 = arith.constant 0 : index
    %0 = vector.load %arg1[%c0, %c0_0, %c0_1] : memref<1x16x192xf32, #tpu.memory_space<vmem>>, vector<1x16x192xf32>
    %1 = vector.shape_cast %0 : vector<1x16x192xf32> to vector<16x192xf32>
    %2 = arith.truncf %1 : vector<16x192xf32> to vector<16x192xbf16>
    %c0_2 = arith.constant 0 : index
    %c0_3 = arith.constant 0 : index
    %3 = vector.load %arg2[%c0_2, %c0_3] : memref<192x32xbf16, #tpu.memory_space<vmem>>, vector<192x32xbf16>
    %cst = arith.constant dense<0.000000e+00> : vector<16x32xf32>
    %4 = tpu.matmul %2, %3, %cst {dimension_numbers = #tpu.dot_dimension_numbers<[1], [0], [0], [1], [0, 0, 1, 1], [], []>} : vector<16x192xbf16>, vector<192x32xbf16>, vector<16x32xf32> -> vector<16x32xf32>
    %c0_4 = arith.constant 0 : index
    %c0_5 = arith.constant 0 : index
    %5 = vector.load %arg3[%c0_4, %c0_5] : memref<1x32xf32, #tpu.memory_space<vmem>>, vector<1x32xf32>
    %6 = vector.broadcast %5 : vector<1x32xf32> to vector<16x32xf32>
    %7 = arith.addf %4, %6 : vector<16x32xf32>
    %c0_6 = arith.constant 0 : index
    %c0_7 = arith.constant 0 : index
    %c0_8 = arith.constant 0 : index
    %8 = vector.load %arg4[%c0_6, %c0_7, %c0_8] : memref<1x1x32xf32, #tpu.memory_space<vmem>>, vector<1x1x32xf32>
    %9 = vector.shape_cast %8 : vector<1x1x32xf32> to vector<1x32xf32>
    %10 = tpu.concatenate %9, %7 in 0 : vector<1x32xf32>, vector<16x32xf32> -> vector<17x32xf32>
    %c0_9 = arith.constant 0 : index
    %c0_10 = arith.constant 0 : index
    %c0_11 = arith.constant 0 : index
    %11 = vector.load %arg5[%c0_9, %c0_10, %c0_11] : memref<1x17x32xf32, #tpu.memory_space<vmem>>, vector<1x17x32xf32>
    %12 = vector.shape_cast %11 : vector<1x17x32xf32> to vector<17x32xf32>
    %13 = arith.addf %10, %12 : vector<17x32xf32>
    %c0_12 = arith.constant 0 : index
    %c0_13 = arith.constant 0 : index
    %c0_14 = arith.constant 0 : index
    %14 = vector.load %arg6[%c0_12, %c0_13, %c0_14] : memref<1x17x32xf32, #tpu.memory_space<vmem>>, vector<1x17x32xf32>
    %15 = vector.shape_cast %14 : vector<1x17x32xf32> to vector<17x32xf32>
    %16 = vector.shape_cast %13 : vector<17x32xf32> to vector<1x17x32xf32>
    tpu.vector_store %arg6[%c0_12, %c0_13, %c0_14], %16 {strides = array<i32>} : memref<1x17x32xf32, #tpu.memory_space<vmem>>, vector<1x17x32xf32>,
    return
  }
  func.func @transform_0(%arg0: i32) -> (i32, i32, i32) {
    %c0_i32 = arith.constant 0 : i32
    %c0_i32_0 = arith.constant 0 : i32
    %c0_i32_1 = arith.constant 0 : i32
    return %arg0, %c0_i32, %c0_i32_0 : i32, i32, i32
  }
  func.func @transform_1(%arg0: i32) -> (i32, i32) {
    %c0_i32 = arith.constant 0 : i32
    %c0_i32_0 = arith.constant 0 : i32
    %c0_i32_1 = arith.constant 0 : i32
    return %c0_i32, %c0_i32_0 : i32, i32
  }
  func.func @transform_2(%arg0: i32) -> (i32, i32) {
    %c0_i32 = arith.constant 0 : i32
    %c0_i32_0 = arith.constant 0 : i32
    %c0_i32_1 = arith.constant 0 : i32
    return %c0_i32, %c0_i32_0 : i32, i32
  }
  func.func @transform_3(%arg0: i32) -> (i32, i32, i32) {
    %c0_i32 = arith.constant 0 : i32
    %c0_i32_0 = arith.constant 0 : i32
    %c0_i32_1 = arith.constant 0 : i32
    %c0_i32_2 = arith.constant 0 : i32
    return %c0_i32, %c0_i32_0, %c0_i32_1 : i32, i32, i32
  }
  func.func @transform_4(%arg0: i32) -> (i32, i32, i32) {
    %c0_i32 = arith.constant 0 : i32
    %c0_i32_0 = arith.constant 0 : i32
    %c0_i32_1 = arith.constant 0 : i32
    %c0_i32_2 = arith.constant 0 : i32
    return %c0_i32, %c0_i32_0, %c0_i32_1 : i32, i32, i32
  }
  func.func @transform_5(%arg0: i32) -> (i32, i32, i32) {
    %c0_i32 = arith.constant 0 : i32
    %c0_i32_0 = arith.constant 0 : i32
    %c0_i32_1 = arith.constant 0 : i32
    return %arg0, %c0_i32, %c0_i32_0 : i32, i32, i32
  }
}

module attributes {stable_mosaic.version = 11 : i64} {
  func.func @_mlp_kernel(%arg0: i32, %arg1: i32, %arg2: memref<1x17x32xf32, #tpu.memory_space<vmem>>, %arg3: memref<1x32xf32, #tpu.memory_space<vmem>>, %arg4: memref<1x32xf32, #tpu.memory_space<vmem>>, %arg5: memref<32x128xbf16, #tpu.memory_space<vmem>>, %arg6: memref<1x128xf32, #tpu.memory_space<vmem>>, %arg7: memref<128x32xbf16, #tpu.memory_space<vmem>>, %arg8: memref<1x32xf32, #tpu.memory_space<vmem>>, %arg9: memref<1x17x32xf32, #tpu.memory_space<vmem>>) attributes {dimension_semantics = [#tpu.dimension_semantics<parallel>, #tpu.dimension_semantics<parallel>], iteration_bounds = array<i64: 2, 1>, scalar_prefetch = 0 : i64, scratch_operands = 0 : i64, tpu.core_type = #tpu.core_type<tc>, window_params = [{transform_indices = @transform_0, window_bounds = array<i64: 1, 17, 32>}, {pipeline_mode = #tpu.pipeline_mode<synchronous>, transform_indices = @transform_1, window_bounds = array<i64: 1, 32>}, {pipeline_mode = #tpu.pipeline_mode<synchronous>, transform_indices = @transform_2, window_bounds = array<i64: 1, 32>}, {pipeline_mode = #tpu.pipeline_mode<synchronous>, transform_indices = @transform_3, window_bounds = array<i64: 32, 128>}, {pipeline_mode = #tpu.pipeline_mode<synchronous>, transform_indices = @transform_4, window_bounds = array<i64: 1, 128>}, {pipeline_mode = #tpu.pipeline_mode<synchronous>, transform_indices = @transform_5, window_bounds = array<i64: 128, 32>}, {pipeline_mode = #tpu.pipeline_mode<synchronous>, transform_indices = @transform_6, window_bounds = array<i64: 1, 32>}, {transform_indices = @transform_7, window_bounds = array<i64: 1, 17, 32>}]} {
    %c0 = arith.constant 0 : index
    %c0_0 = arith.constant 0 : index
    %c0_1 = arith.constant 0 : index
    %0 = vector.load %arg2[%c0, %c0_0, %c0_1] : memref<1x17x32xf32, #tpu.memory_space<vmem>>, vector<1x17x32xf32>
    %1 = vector.shape_cast %0 : vector<1x17x32xf32> to vector<17x32xf32>
    %c0_2 = arith.constant 0 : index
    %c0_3 = arith.constant 0 : index
    %2 = vector.load %arg3[%c0_2, %c0_3] : memref<1x32xf32, #tpu.memory_space<vmem>>, vector<1x32xf32>
    %c0_4 = arith.constant 0 : index
    %c0_5 = arith.constant 0 : index
    %3 = vector.load %arg4[%c0_4, %c0_5] : memref<1x32xf32, #tpu.memory_space<vmem>>, vector<1x32xf32>
    %cst = arith.constant dense<0.000000e+00> : vector<17xf32>
    %4 = vector.multi_reduction <add>, %1, %cst [1] : vector<17x32xf32> to vector<17xf32>
    %5 = vector.shape_cast %4 : vector<17xf32> to vector<17x1xf32>
    %cst_6 = arith.constant 3.200000e+01 : f32
    %6 = vector.broadcast %cst_6 : f32 to vector<17x1xf32>
    %7 = arith.divf %5, %6 : vector<17x1xf32>
    %8 = vector.broadcast %7 : vector<17x1xf32> to vector<17x32xf32>
    %9 = arith.subf %1, %8 : vector<17x32xf32>
    %10 = arith.mulf %9, %9 : vector<17x32xf32>
    %cst_7 = arith.constant dense<0.000000e+00> : vector<17xf32>
    %11 = vector.multi_reduction <add>, %10, %cst_7 [1] : vector<17x32xf32> to vector<17xf32>
    %12 = vector.shape_cast %11 : vector<17xf32> to vector<17x1xf32>
    %cst_8 = arith.constant 3.200000e+01 : f32
    %13 = vector.broadcast %cst_8 : f32 to vector<17x1xf32>
    %14 = arith.divf %12, %13 : vector<17x1xf32>
    %cst_9 = arith.constant 9.99999997E-7 : f32
    %15 = vector.broadcast %cst_9 : f32 to vector<17x1xf32>
    %16 = arith.addf %14, %15 : vector<17x1xf32>
    %17 = math.rsqrt %16 : vector<17x1xf32>
    %18 = vector.broadcast %17 : vector<17x1xf32> to vector<17x32xf32>
    %19 = arith.mulf %9, %18 : vector<17x32xf32>
    %20 = vector.broadcast %2 : vector<1x32xf32> to vector<17x32xf32>
    %21 = arith.mulf %19, %20 : vector<17x32xf32>
    %22 = vector.broadcast %3 : vector<1x32xf32> to vector<17x32xf32>
    %23 = arith.addf %21, %22 : vector<17x32xf32>
    %24 = arith.truncf %23 : vector<17x32xf32> to vector<17x32xbf16>
    %c0_10 = arith.constant 0 : index
    %c0_11 = arith.constant 0 : index
    %25 = vector.load %arg5[%c0_10, %c0_11] : memref<32x128xbf16, #tpu.memory_space<vmem>>, vector<32x128xbf16>
    %cst_12 = arith.constant dense<0.000000e+00> : vector<17x128xf32>
    %26 = tpu.matmul %24, %25, %cst_12 {dimension_numbers = #tpu.dot_dimension_numbers<[1], [0], [0], [1], [0, 0, 1, 1], [], []>} : vector<17x32xbf16>, vector<32x128xbf16>, vector<17x128xf32> -> vector<17x128xf32>
    %c0_13 = arith.constant 0 : index
    %c0_14 = arith.constant 0 : index
    %27 = vector.load %arg6[%c0_13, %c0_14] : memref<1x128xf32, #tpu.memory_space<vmem>>, vector<1x128xf32>
    %28 = vector.broadcast %27 : vector<1x128xf32> to vector<17x128xf32>
    %29 = arith.addf %26, %28 : vector<17x128xf32>
    %30 = arith.mulf %29, %29 : vector<17x128xf32>
    %31 = arith.mulf %29, %30 : vector<17x128xf32>
    %cst_15 = arith.constant 4.471500e-02 : f32
    %32 = vector.broadcast %cst_15 : f32 to vector<17x128xf32>
    %33 = arith.mulf %32, %31 : vector<17x128xf32>
    %34 = arith.addf %29, %33 : vector<17x128xf32>
    %cst_16 = arith.constant 0.797884583 : f32
    %35 = vector.broadcast %cst_16 : f32 to vector<17x128xf32>
    %36 = arith.mulf %35, %34 : vector<17x128xf32>
    %37 = math.tanh %36 : vector<17x128xf32>
    %cst_17 = arith.constant 1.000000e+00 : f32
    %38 = vector.broadcast %cst_17 : f32 to vector<17x128xf32>
    %39 = arith.addf %38, %37 : vector<17x128xf32>
    %cst_18 = arith.constant 5.000000e-01 : f32
    %40 = vector.broadcast %cst_18 : f32 to vector<17x128xf32>
    %41 = arith.mulf %40, %39 : vector<17x128xf32>
    %42 = arith.mulf %29, %41 : vector<17x128xf32>
    %43 = arith.truncf %42 : vector<17x128xf32> to vector<17x128xbf16>
    %c0_19 = arith.constant 0 : index
    %c0_20 = arith.constant 0 : index
    %44 = vector.load %arg7[%c0_19, %c0_20] : memref<128x32xbf16, #tpu.memory_space<vmem>>, vector<128x32xbf16>
    %cst_21 = arith.constant dense<0.000000e+00> : vector<17x32xf32>
    %45 = tpu.matmul %43, %44, %cst_21 {dimension_numbers = #tpu.dot_dimension_numbers<[1], [0], [0], [1], [0, 0, 1, 1], [], []>} : vector<17x128xbf16>, vector<128x32xbf16>, vector<17x32xf32> -> vector<17x32xf32>
    %c0_22 = arith.constant 0 : index
    %c0_23 = arith.constant 0 : index
    %46 = vector.load %arg8[%c0_22, %c0_23] : memref<1x32xf32, #tpu.memory_space<vmem>>, vector<1x32xf32>
    %47 = vector.broadcast %46 : vector<1x32xf32> to vector<17x32xf32>
    %48 = arith.addf %45, %47 : vector<17x32xf32>
    %49 = arith.addf %1, %48 : vector<17x32xf32>
    %c0_24 = arith.constant 0 : index
    %c0_25 = arith.constant 0 : index
    %c0_26 = arith.constant 0 : index
    %50 = vector.load %arg9[%c0_24, %c0_25, %c0_26] : memref<1x17x32xf32, #tpu.memory_space<vmem>>, vector<1x17x32xf32>
    %51 = vector.shape_cast %50 : vector<1x17x32xf32> to vector<17x32xf32>
    %52 = vector.shape_cast %49 : vector<17x32xf32> to vector<1x17x32xf32>
    tpu.vector_store %arg9[%c0_24, %c0_25, %c0_26], %52 {strides = array<i32>} : memref<1x17x32xf32, #tpu.memory_space<vmem>>, vector<1x17x32xf32>,
    return
  }
  func.func @transform_0(%arg0: i32, %arg1: i32) -> (i32, i32, i32) {
    %c0_i32 = arith.constant 0 : i32
    %c0_i32_0 = arith.constant 0 : i32
    return %arg0, %arg1, %c0_i32 : i32, i32, i32
  }
  func.func @transform_1(%arg0: i32, %arg1: i32) -> (i32, i32) {
    %c0_i32 = arith.constant 0 : i32
    %c0_i32_0 = arith.constant 0 : i32
    %c0_i32_1 = arith.constant 0 : i32
    return %c0_i32, %c0_i32_0 : i32, i32
  }
  func.func @transform_2(%arg0: i32, %arg1: i32) -> (i32, i32) {
    %c0_i32 = arith.constant 0 : i32
    %c0_i32_0 = arith.constant 0 : i32
    %c0_i32_1 = arith.constant 0 : i32
    return %c0_i32, %c0_i32_0 : i32, i32
  }
  func.func @transform_3(%arg0: i32, %arg1: i32) -> (i32, i32) {
    %c0_i32 = arith.constant 0 : i32
    %c0_i32_0 = arith.constant 0 : i32
    %c0_i32_1 = arith.constant 0 : i32
    return %c0_i32, %c0_i32_0 : i32, i32
  }
  func.func @transform_4(%arg0: i32, %arg1: i32) -> (i32, i32) {
    %c0_i32 = arith.constant 0 : i32
    %c0_i32_0 = arith.constant 0 : i32
    %c0_i32_1 = arith.constant 0 : i32
    return %c0_i32, %c0_i32_0 : i32, i32
  }
  func.func @transform_5(%arg0: i32, %arg1: i32) -> (i32, i32) {
    %c0_i32 = arith.constant 0 : i32
    %c0_i32_0 = arith.constant 0 : i32
    %c0_i32_1 = arith.constant 0 : i32
    return %c0_i32, %c0_i32_0 : i32, i32
  }
  func.func @transform_6(%arg0: i32, %arg1: i32) -> (i32, i32) {
    %c0_i32 = arith.constant 0 : i32
    %c0_i32_0 = arith.constant 0 : i32
    %c0_i32_1 = arith.constant 0 : i32
    return %c0_i32, %c0_i32_0 : i32, i32
  }
  func.func @transform_7(%arg0: i32, %arg1: i32) -> (i32, i32, i32) {
    %c0_i32 = arith.constant 0 : i32
    %c0_i32_0 = arith.constant 0 : i32
    return %arg0, %arg1, %c0_i32 : i32, i32, i32
  }
}

module attributes {stable_mosaic.version = 11 : i64} {
  func.func @_attn_fused_kernel(%arg0: i32, %arg1: i32, %arg2: memref<1x17x32xf32, #tpu.memory_space<vmem>>, %arg3: memref<1x32xf32, #tpu.memory_space<vmem>>, %arg4: memref<1x32xf32, #tpu.memory_space<vmem>>, %arg5: memref<1x32x24xbf16, #tpu.memory_space<vmem>>, %arg6: memref<1x1x24xf32, #tpu.memory_space<vmem>>, %arg7: memref<1x8x32xbf16, #tpu.memory_space<vmem>>, %arg8: memref<1x32xf32, #tpu.memory_space<vmem>>, %arg9: memref<1x17x32xf32, #tpu.memory_space<vmem>>, %arg10: memref<17x32xbf16, #tpu.memory_space<vmem>>, %arg11: memref<17x32xf32, #tpu.memory_space<vmem>>) attributes {dimension_semantics = [#tpu.dimension_semantics<parallel>, #tpu.dimension_semantics<arbitrary>], iteration_bounds = array<i64: 2, 4>, scalar_prefetch = 0 : i64, scratch_operands = 2 : i64, tpu.core_type = #tpu.core_type<tc>, window_params = [{transform_indices = @transform_0, window_bounds = array<i64: 1, 17, 32>}, {pipeline_mode = #tpu.pipeline_mode<synchronous>, transform_indices = @transform_1, window_bounds = array<i64: 1, 32>}, {pipeline_mode = #tpu.pipeline_mode<synchronous>, transform_indices = @transform_2, window_bounds = array<i64: 1, 32>}, {transform_indices = @transform_3, window_bounds = array<i64: 1, 32, 24>}, {transform_indices = @transform_4, window_bounds = array<i64: 1, 1, 24>}, {transform_indices = @transform_5, window_bounds = array<i64: 1, 8, 32>}, {pipeline_mode = #tpu.pipeline_mode<synchronous>, transform_indices = @transform_6, window_bounds = array<i64: 1, 32>}, {transform_indices = @transform_7, window_bounds = array<i64: 1, 17, 32>}]} {
    %c0_i32 = arith.constant 0 : i32
    %0 = arith.cmpi eq, %arg1, %c0_i32 : i32
    %1 = arith.extui %0 : i1 to i32
    %c0_i32_0 = arith.constant 0 : i32
    %2 = arith.cmpi ne, %1, %c0_i32_0 : i32
    scf.if %2 {
      %c0_22 = arith.constant 0 : index
      %c0_23 = arith.constant 0 : index
      %c0_24 = arith.constant 0 : index
      %42 = vector.load %arg2[%c0_22, %c0_23, %c0_24] : memref<1x17x32xf32, #tpu.memory_space<vmem>>, vector<1x17x32xf32>
      %43 = vector.shape_cast %42 : vector<1x17x32xf32> to vector<17x32xf32>
      %c0_25 = arith.constant 0 : index
      %c0_26 = arith.constant 0 : index
      %44 = vector.load %arg3[%c0_25, %c0_26] : memref<1x32xf32, #tpu.memory_space<vmem>>, vector<1x32xf32>
      %c0_27 = arith.constant 0 : index
      %c0_28 = arith.constant 0 : index
      %45 = vector.load %arg4[%c0_27, %c0_28] : memref<1x32xf32, #tpu.memory_space<vmem>>, vector<1x32xf32>
      %cst_29 = arith.constant dense<0.000000e+00> : vector<17xf32>
      %46 = vector.multi_reduction <add>, %43, %cst_29 [1] : vector<17x32xf32> to vector<17xf32>
      %47 = vector.shape_cast %46 : vector<17xf32> to vector<17x1xf32>
      %cst_30 = arith.constant 3.200000e+01 : f32
      %48 = vector.broadcast %cst_30 : f32 to vector<17x1xf32>
      %49 = arith.divf %47, %48 : vector<17x1xf32>
      %50 = vector.broadcast %49 : vector<17x1xf32> to vector<17x32xf32>
      %51 = arith.subf %43, %50 : vector<17x32xf32>
      %52 = arith.mulf %51, %51 : vector<17x32xf32>
      %cst_31 = arith.constant dense<0.000000e+00> : vector<17xf32>
      %53 = vector.multi_reduction <add>, %52, %cst_31 [1] : vector<17x32xf32> to vector<17xf32>
      %54 = vector.shape_cast %53 : vector<17xf32> to vector<17x1xf32>
      %cst_32 = arith.constant 3.200000e+01 : f32
      %55 = vector.broadcast %cst_32 : f32 to vector<17x1xf32>
      %56 = arith.divf %54, %55 : vector<17x1xf32>
      %cst_33 = arith.constant 9.99999997E-7 : f32
      %57 = vector.broadcast %cst_33 : f32 to vector<17x1xf32>
      %58 = arith.addf %56, %57 : vector<17x1xf32>
      %59 = math.rsqrt %58 : vector<17x1xf32>
      %60 = vector.broadcast %59 : vector<17x1xf32> to vector<17x32xf32>
      %61 = arith.mulf %51, %60 : vector<17x32xf32>
      %62 = vector.broadcast %44 : vector<1x32xf32> to vector<17x32xf32>
      %63 = arith.mulf %61, %62 : vector<17x32xf32>
      %64 = vector.broadcast %45 : vector<1x32xf32> to vector<17x32xf32>
      %65 = arith.addf %63, %64 : vector<17x32xf32>
      %66 = arith.truncf %65 : vector<17x32xf32> to vector<17x32xbf16>
      %c0_34 = arith.constant 0 : index
      %c0_35 = arith.constant 0 : index
      %67 = vector.load %arg10[%c0_34, %c0_35] : memref<17x32xbf16, #tpu.memory_space<vmem>>, vector<17x32xbf16>
      tpu.vector_store %arg10[%c0_34, %c0_35], %66 {strides = array<i32>} : memref<17x32xbf16, #tpu.memory_space<vmem>>, vector<17x32xbf16>,
      %c0_36 = arith.constant 0 : index
      %c0_37 = arith.constant 0 : index
      %68 = vector.load %arg8[%c0_36, %c0_37] : memref<1x32xf32, #tpu.memory_space<vmem>>, vector<1x32xf32>
      %69 = vector.broadcast %68 : vector<1x32xf32> to vector<17x32xf32>
      %70 = arith.addf %43, %69 : vector<17x32xf32>
      %c0_38 = arith.constant 0 : index
      %c0_39 = arith.constant 0 : index
      %71 = vector.load %arg11[%c0_38, %c0_39] : memref<17x32xf32, #tpu.memory_space<vmem>>, vector<17x32xf32>
      tpu.vector_store %arg11[%c0_38, %c0_39], %70 {strides = array<i32>} : memref<17x32xf32, #tpu.memory_space<vmem>>, vector<17x32xf32>,
    } else {
    }
    %c0 = arith.constant 0 : index
    %c0_1 = arith.constant 0 : index
    %3 = vector.load %arg10[%c0, %c0_1] : memref<17x32xbf16, #tpu.memory_space<vmem>>, vector<17x32xbf16>
    %c0_2 = arith.constant 0 : index
    %c0_3 = arith.constant 0 : index
    %c0_4 = arith.constant 0 : index
    %4 = vector.load %arg5[%c0_2, %c0_3, %c0_4] : memref<1x32x24xbf16, #tpu.memory_space<vmem>>, vector<1x32x24xbf16>
    %5 = vector.shape_cast %4 : vector<1x32x24xbf16> to vector<32x24xbf16>
    %cst = arith.constant dense<0.000000e+00> : vector<17x24xf32>
    %6 = tpu.matmul %3, %5, %cst {dimension_numbers = #tpu.dot_dimension_numbers<[1], [0], [0], [1], [0, 0, 1, 1], [], []>} : vector<17x32xbf16>, vector<32x24xbf16>, vector<17x24xf32> -> vector<17x24xf32>
    %c0_5 = arith.constant 0 : index
    %c0_6 = arith.constant 0 : index
    %c0_7 = arith.constant 0 : index
    %7 = vector.load %arg6[%c0_5, %c0_6, %c0_7] : memref<1x1x24xf32, #tpu.memory_space<vmem>>, vector<1x1x24xf32>
    %8 = vector.shape_cast %7 : vector<1x1x24xf32> to vector<1x24xf32>
    %9 = vector.broadcast %8 : vector<1x24xf32> to vector<17x24xf32>
    %10 = arith.addf %6, %9 : vector<17x24xf32>
    %11 = vector.extract_strided_slice %10 {offsets = [0, 0], sizes = [17, 8], strides = [1, 1]} : vector<17x24xf32> to vector<17x8xf32>
    %cst_8 = arith.constant 0.353553385 : f32
    %12 = vector.broadcast %cst_8 : f32 to vector<17x8xf32>
    %13 = arith.mulf %11, %12 : vector<17x8xf32>
    %14 = arith.truncf %13 : vector<17x8xf32> to vector<17x8xbf16>
    %15 = vector.extract_strided_slice %10 {offsets = [0, 8], sizes = [17, 8], strides = [1, 1]} : vector<17x24xf32> to vector<17x8xf32>
    %16 = arith.truncf %15 : vector<17x8xf32> to vector<17x8xbf16>
    %17 = vector.extract_strided_slice %10 {offsets = [0, 16], sizes = [17, 8], strides = [1, 1]} : vector<17x24xf32> to vector<17x8xf32>
    %18 = arith.truncf %17 : vector<17x8xf32> to vector<17x8xbf16>
    %cst_9 = arith.constant dense<0.000000e+00> : vector<17x17xf32>
    %19 = tpu.matmul %14, %16, %cst_9 {dimension_numbers = #tpu.dot_dimension_numbers<[1], [1], [0], [0], [0, 0, 1, 0], [], []>} : vector<17x8xbf16>, vector<17x8xbf16>, vector<17x17xf32> -> vector<17x17xf32>
    %cst_10 = arith.constant dense<0xFF800000> : vector<17xf32>
    %20 = vector.multi_reduction <maximumf>, %19, %cst_10 [1] : vector<17x17xf32> to vector<17xf32>
    %21 = vector.shape_cast %20 : vector<17xf32> to vector<17x1xf32>
    %22 = vector.broadcast %21 : vector<17x1xf32> to vector<17x17xf32>
    %23 = arith.subf %19, %22 : vector<17x17xf32>
    %24 = math.exp %23 : vector<17x17xf32>
    %cst_11 = arith.constant dense<0.000000e+00> : vector<17xf32>
    %25 = vector.multi_reduction <add>, %24, %cst_11 [1] : vector<17x17xf32> to vector<17xf32>
    %26 = vector.shape_cast %25 : vector<17xf32> to vector<17x1xf32>
    %27 = tpu.reciprocal %26 {approx = true} : vector<17x1xf32> -> vector<17x1xf32>
    %28 = vector.broadcast %27 : vector<17x1xf32> to vector<17x17xf32>
    %29 = arith.mulf %24, %28 : vector<17x17xf32>
    %30 = arith.truncf %29 : vector<17x17xf32> to vector<17x17xbf16>
    %cst_12 = arith.constant dense<0.000000e+00> : vector<17x8xf32>
    %31 = tpu.matmul %30, %18, %cst_12 {dimension_numbers = #tpu.dot_dimension_numbers<[1], [0], [0], [1], [0, 0, 1, 1], [], []>} : vector<17x17xbf16>, vector<17x8xbf16>, vector<17x8xf32> -> vector<17x8xf32>
    %c0_13 = arith.constant 0 : index
    %c0_14 = arith.constant 0 : index
    %32 = vector.load %arg11[%c0_13, %c0_14] : memref<17x32xf32, #tpu.memory_space<vmem>>, vector<17x32xf32>
    %33 = arith.truncf %31 : vector<17x8xf32> to vector<17x8xbf16>
    %c0_15 = arith.constant 0 : index
    %c0_16 = arith.constant 0 : index
    %c0_17 = arith.constant 0 : index
    %34 = vector.load %arg7[%c0_15, %c0_16, %c0_17] : memref<1x8x32xbf16, #tpu.memory_space<vmem>>, vector<1x8x32xbf16>
    %35 = vector.shape_cast %34 : vector<1x8x32xbf16> to vector<8x32xbf16>
    %cst_18 = arith.constant dense<0.000000e+00> : vector<17x32xf32>
    %36 = tpu.matmul %33, %35, %cst_18 {dimension_numbers = #tpu.dot_dimension_numbers<[1], [0], [0], [1], [0, 0, 1, 1], [], []>} : vector<17x8xbf16>, vector<8x32xbf16>, vector<17x32xf32> -> vector<17x32xf32>
    %37 = arith.addf %32, %36 : vector<17x32xf32>
    %c0_19 = arith.constant 0 : index
    %c0_20 = arith.constant 0 : index
    %38 = vector.load %arg11[%c0_19, %c0_20] : memref<17x32xf32, #tpu.memory_space<vmem>>, vector<17x32xf32>
    tpu.vector_store %arg11[%c0_19, %c0_20], %37 {strides = array<i32>} : memref<17x32xf32, #tpu.memory_space<vmem>>, vector<17x32xf32>,
    %c3_i32 = arith.constant 3 : i32
    %39 = arith.cmpi eq, %arg1, %c3_i32 : i32
    %40 = arith.extui %39 : i1 to i32
    %c0_i32_21 = arith.constant 0 : i32
    %41 = arith.cmpi ne, %40, %c0_i32_21 : i32
    scf.if %41 {
      %c0_22 = arith.constant 0 : index
      %c0_23 = arith.constant 0 : index
      %42 = vector.load %arg11[%c0_22, %c0_23] : memref<17x32xf32, #tpu.memory_space<vmem>>, vector<17x32xf32>
      %c0_24 = arith.constant 0 : index
      %c0_25 = arith.constant 0 : index
      %c0_26 = arith.constant 0 : index
      %43 = vector.load %arg9[%c0_24, %c0_25, %c0_26] : memref<1x17x32xf32, #tpu.memory_space<vmem>>, vector<1x17x32xf32>
      %44 = vector.shape_cast %43 : vector<1x17x32xf32> to vector<17x32xf32>
      %45 = vector.shape_cast %42 : vector<17x32xf32> to vector<1x17x32xf32>
      tpu.vector_store %arg9[%c0_24, %c0_25, %c0_26], %45 {strides = array<i32>} : memref<1x17x32xf32, #tpu.memory_space<vmem>>, vector<1x17x32xf32>,
    } else {
    }
    return
  }
  func.func @transform_0(%arg0: i32, %arg1: i32) -> (i32, i32, i32) {
    %c0_i32 = arith.constant 0 : i32
    %c0_i32_0 = arith.constant 0 : i32
    %c0_i32_1 = arith.constant 0 : i32
    return %arg0, %c0_i32, %c0_i32_0 : i32, i32, i32
  }
  func.func @transform_1(%arg0: i32, %arg1: i32) -> (i32, i32) {
    %c0_i32 = arith.constant 0 : i32
    %c0_i32_0 = arith.constant 0 : i32
    %c0_i32_1 = arith.constant 0 : i32
    return %c0_i32, %c0_i32_0 : i32, i32
  }
  func.func @transform_2(%arg0: i32, %arg1: i32) -> (i32, i32) {
    %c0_i32 = arith.constant 0 : i32
    %c0_i32_0 = arith.constant 0 : i32
    %c0_i32_1 = arith.constant 0 : i32
    return %c0_i32, %c0_i32_0 : i32, i32
  }
  func.func @transform_3(%arg0: i32, %arg1: i32) -> (i32, i32, i32) {
    %c0_i32 = arith.constant 0 : i32
    %c0_i32_0 = arith.constant 0 : i32
    %c0_i32_1 = arith.constant 0 : i32
    return %arg1, %c0_i32, %c0_i32_0 : i32, i32, i32
  }
  func.func @transform_4(%arg0: i32, %arg1: i32) -> (i32, i32, i32) {
    %c0_i32 = arith.constant 0 : i32
    %c0_i32_0 = arith.constant 0 : i32
    %c0_i32_1 = arith.constant 0 : i32
    return %arg1, %c0_i32, %c0_i32_0 : i32, i32, i32
  }
  func.func @transform_5(%arg0: i32, %arg1: i32) -> (i32, i32, i32) {
    %c0_i32 = arith.constant 0 : i32
    %c0_i32_0 = arith.constant 0 : i32
    %c0_i32_1 = arith.constant 0 : i32
    return %arg1, %c0_i32, %c0_i32_0 : i32, i32, i32
  }
  func.func @transform_6(%arg0: i32, %arg1: i32) -> (i32, i32) {
    %c0_i32 = arith.constant 0 : i32
    %c0_i32_0 = arith.constant 0 : i32
    %c0_i32_1 = arith.constant 0 : i32
    return %c0_i32, %c0_i32_0 : i32, i32
  }
  func.func @transform_7(%arg0: i32, %arg1: i32) -> (i32, i32, i32) {
    %c0_i32 = arith.constant 0 : i32
    %c0_i32_0 = arith.constant 0 : i32
    %c0_i32_1 = arith.constant 0 : i32
    return %arg0, %c0_i32, %c0_i32_0 : i32, i32, i32
  }
}

</mosaic_0001>

<bundles_post_ra>
// kernel: dino_forward.5
= control target key start
LH: loop header
LB: loop body
LE: loop exit
PB: predicated region body
PF: predicated region fallthrough
CT: control target
= control target key end

     0   :  { %s543_s18 = smov 0   ;;  %s621_s0 = inlined_call_operand.vmem [shape: f32[2,16,192], index: 0, kind: input, shape index: {}]   ;;  %s622_s1 = inlined_call_operand.vmem [shape: bf16[192,32], index: 1, kind: input, shape index: {}]   ;;  %s623_s2 = inlined_call_operand.vmem [shape: f32[1,32], index: 2, kind: input, shape index: {}]   ;;  %s624_s3 = inlined_call_operand.vmem [shape: f32[1,1,32], index: 3, kind: input, shape index: {}]   ;;  %s625_s4 = inlined_call_operand.vmem [shape: f32[1,17,32], index: 4, kind: input, shape index: {}]   ;;  %s626_s5 = inlined_call_operand.vmem [shape: f32[2,17,32], index: 5, kind: output, shape index: {}]  }
   0x1 LB: > { %s457_s19 = sadd.s32 4294967295, %s510_s18   ;;  %p461_p0 = scmp.ge.s32.totalorder %s510_s18, 1  ;;  %s510_s18 = sphi %s543_s18, %s15_s18  }
   0x2   : > { %p187_p1 = scmp.lt.s32.totalorder %s510_s18, 3 }
   0x4   : > { %p188_p2 = pnand %p461_p0, %p187_p1 }
   0x5   : > { %v492_v0 = vld [vmem:[%s622_s1] sm:$0xff] (!%p188_p2)   ;;  %v512_v1 = vmov (!%p188_p2), 0   ;;  %p215_p3 = scmp.lt.s32.totalorder (!%p188_p2), %s457_s19, 1  ;;  %v493_v2 = vld [vmem:[%s622_s1 + $0x8] sm:$0xff] (!%p188_p2)   ;;  %v494_v3 = vld [vmem:[%s622_s1 + $0x10] sm:$0xff] (!%p188_p2)   ;;  %vm335_vm0 = vcmask (!%p188_p2), 523264  }
   0x6   : > { %191 = sbr.rel (%p188_p2) target bundleno = 276 (0x114), region = 40  ;;  %339 = vmatprep.subr.bf16.mxu0 (!%p188_p2), %v512_v1  ;;  %v495_v4 = vld [vmem:[%s622_s1 + $0x18] sm:$0xff] (!%p188_p2)   ;;  %v496_v8 = vld [vmem:[%s622_s1 + $0x20] sm:$0xff] (!%p188_p2)   ;;  %v497_v9 = vld [vmem:[%s622_s1 + $0x28] sm:$0xff] (!%p188_p2)   ;;  %vm383_vm1 = vcmask (!%p188_p2), 1040384   ;;  %vm397_vm2 = vcmask (!%p188_p2), 261120  }
   0x7   : > { %340 = vmatpush1.bf16.msra.mxu0 (!%p188_p2), %v492_v0  ;;  %v498_v10 = vld [vmem:[%s622_s1 + $0x30] sm:$0xff] (!%p188_p2)   ;;  %v499_v11 = vld [vmem:[%s622_s1 + $0x38] sm:$0xff] (!%p188_p2)   ;;  %v500_v12 = vld [vmem:[%s622_s1 + $0x40] sm:$0xff] (!%p188_p2)   ;;  %vm400_vm3 = vcmask (!%p188_p2), 253952  }
   0x8   : > { %341 = vmatprep.subr.bf16.mxu0 (!%p188_p2), %v512_v1  ;;  %v501_v13 = vld [vmem:[%s622_s1 + $0x48] sm:$0xff] (!%p188_p2)   ;;  %v502_v14 = vld [vmem:[%s622_s1 + $0x50] sm:$0xff] (!%p188_p2)   ;;  %v503_v15 = vld [vmem:[%s622_s1 + $0x58] sm:$0xff] (!%p188_p2)  }
   0x9   : > { %v465_v19 = vld [vmem:[%s623_s2] ss:$0 sm:$0xff] (!%p188_p2)  ;;  %v393_v29 = vld [vmem:[%s625_s4 + $0x10] sm:$0x1] (!%p188_p2)  ;;  %v392_v32 = vld [vmem:[%s625_s4 + $0x8] sm:$0xff] (!%p188_p2) }
   0xa   : > { %v380_v23 = vld [vmem:[%s624_s3] sm:$0x1] (!%p188_p2) }
   0xb   : > { %342 = vmatpush1.bf16.msra.mxu0 (!%p188_p2), %v493_v2  ;;  %v391_v26 = vld [vmem:[%s625_s4] sm:$0xff] (!%p188_p2) }
   0xc   : > { %343 = vmatprep.subr.bf16.mxu0 (!%p188_p2), %v512_v1 }
   0xd   : > { %s628_s19 = smov (!%p215_p3, %s457_s19), 1 }
   0xe   : > { %s481_s26 = sshll.u32 %s628_s19, 5  ;;  %s482_s27 = smul.u32 24, %s628_s19 }
   0xf   : > { %s566_s29 = scalar_lea.vmem %s621_s0, %s481_s26  ;;  %344 = vmatpush1.bf16.msra.mxu0 %v494_v3 }
  0x10   : > { %345 = vmatprep.subr.bf16.mxu0 %v512_v1  ;;  %v227_v5 = vld [vmem:[%s566_s29 + $0x8] sm:$0xff]  ;;  %v229_v6 = vld [vmem:[%s566_s29 + $0x18] sm:$0xff]  ;;  %v226_v16 = vld [vmem:[%s566_s29] sm:$0xff]  ;;  %s224_s10 = scalar_lea.vmem %s626_s5, %s482_s27 }
  0x11   : > { %v231_v7 = vpack.c.bf16 %v229_v6, %v227_v5  ;;  %v228_v17 = vld [vmem:[%s566_s29 + $0x10] sm:$0xff] }
  0x12   : > { %v230_v18 = vpack.c.bf16 %v228_v17, %v226_v16 }
  0x13   : > { %346 = vmatpush1.bf16.msra.mxu0 %v495_v4  ;;  %478 = vmatprep.mubr.msk.bf16.mxu0 %vm335_vm0, %v231_v7 }
  0x14   : > { %347 = vmatprep.subr.bf16.mxu0 %v512_v1 }
  0x17   : > { %348 = vmatpush1.bf16.msra.mxu0 %v496_v8 }
  0x18   : > { %349 = vmatprep.subr.bf16.mxu0 %v512_v1 }
  0x1b   : > { %350 = vmatpush1.bf16.msra.mxu0 %v497_v9 }
  0x1c   : > { %351 = vmatprep.subr.bf16.mxu0 %v512_v1 }
  0x1f   : > { %352 = vmatpush1.bf16.msra.mxu0 %v498_v10 }
  0x20   : > { %353 = vmatprep.subr.bf16.mxu0 %v512_v1 }
  0x23   : > { %354 = vmatpush1.bf16.msra.mxu0 %v499_v11 }
  0x24   : > { %355 = vmatprep.subr.bf16.mxu0 %v512_v1 }
  0x27   : > { %356 = vmatpush1.bf16.msra.mxu0 %v500_v12 }
  0x28   : > { %357 = vmatprep.subr.bf16.mxu0 %v512_v1 }
  0x2b   : > { %358 = vmatpush1.bf16.msra.mxu0 %v501_v13 }
  0x2c   : > { %359 = vmatprep.subr.bf16.mxu0 %v512_v1 }
  0x2f   : > { %360 = vmatpush1.bf16.msra.mxu0 %v502_v14 }
  0x30   : > { %361 = vmatprep.subr.bf16.mxu0 %v512_v1 }
  0x33   : > { %362 = vmatpush1.bf16.msra.mxu0 %v503_v15 }
  0x36   : > { %372 = vmatmul.mubr.bf16.vlgmr.msra.gmra.mrb[0].mxu0 %v230_v18 }
 0x109   : > { %v373_v20 = vpop.f32.mrb[0].mxu0 }
 0x10a   : > { %v374_v21 = vadd.f32 %v465_v19, %v373_v20  ;;  %v375_v22 = vpop.f32.mrb[1].mxu0 }
 0x10b   : > { %v376_v24 = vpop.f32.mrb[2].mxu0 }
 0x10c   : > { %v384_v25 = vrot.slane %v374_v21, 7  ;;  %v377_v27 = vadd.f32 %v465_v19, %v376_v24  ;;  %v378_v28 = vpop.f32.mrb[3].mxu0 }
 0x10e   : > { %v390_v30 = vsel %vm383_vm1, %v380_v23, %v384_v25  ;;  %v385_v31 = vrot.slane %v377_v27, 7 }
 0x10f   : > { %v394_v33 = vadd.f32 %v391_v26, %v390_v30 }
 0x110   : > { %v386_v34 = vsel %vm383_vm1, %v384_v25, %v385_v31  ;;  %v396_v35 = vadd.f32 %v393_v29, %v385_v31 }
 0x111   : > { %v395_v36 = vadd.f32 %v392_v32, %v386_v34  ;;  %398 = vst.msk [vmem:[%s224_s10] sm:$0xff] %vm397_vm2, %v394_v33 }
 0x112   : > { %401 = vst.msk [vmem:[%s224_s10 + $0x10] sm:$0x1] %vm400_vm3, %v396_v35 }
 0x113   : > { %399 = vst.msk [vmem:[%s224_s10 + $0x8] sm:$0xff] %vm397_vm2, %v395_v36 }
 0x114 PF: > { %s15_s18 = sadd.s32 1, %s510_s18  }
 0x115   : > { %p12_p4 = scmp.ge.s32.totalorder %s15_s18, 4  }
 0x117   :  { %14 = sbr.rel (!%p12_p4) target bundleno = 1 (0x1), region = 70 }

// kernel: dino_forward.7
= control target key start
LH: loop header
LB: loop body
LE: loop exit
PB: predicated region body
PF: predicated region fallthrough
CT: control target
= control target key end

     0   :  { %s882_s24 = smov 0   ;;  %s884_s25 = smov 0   ;;  %s990_s0 = inlined_call_operand.vmem [shape: f32[2,17,32], index: 0, kind: input, shape index: {}, may-alias: {0,7}]   ;;  %s991_s1 = inlined_call_operand.vmem [shape: f32[1,32], index: 1, kind: input, shape index: {}]   ;;  %s992_s2 = inlined_call_operand.vmem [shape: f32[1,32], index: 2, kind: input, shape index: {}]   ;;  %s993_s3 = inlined_call_operand.vmem [shape: bf16[32,128], index: 3, kind: input, shape index: {}]   ;;  %s994_s4 = inlined_call_operand.vmem [shape: f32[1,128], index: 4, kind: input, shape index: {}]   ;;  %s995_s5 = inlined_call_operand.vmem [shape: bf16[128,32], index: 5, kind: input, shape index: {}]   ;;  %s996_s6 = inlined_call_operand.vmem [shape: f32[1,32], index: 6, kind: input, shape index: {}]   ;;  %s997_s7 = inlined_call_operand.vmem [shape: f32[2,17,32], index: 7, kind: output, shape index: {}, may-alias: {0,7}]  }
   0x1   :  { %s886_s26 = smov 0  }
   0x2 LB: > { %s29_s27 = sadd.s32 1, %s836_s25  ;;  %p708_p0 = scmp.ge.s32.totalorder %s840_s26, 1  ;;  %s840_s26 = sphi %s886_s26, %s17_s26   ;;  %s836_s25 = sphi %s884_s25, %s999_s25   ;;  %s832_s24 = sphi %s882_s24, %s998_s24  }
   0x3   : > { %p31_p1 = scmp.ge.s32.totalorder %s29_s27, 2  ;;  %p258_p2 = scmp.lt.s32.totalorder %s840_s26, 3 }
   0x5   : > { %s1001_s27 = smov (%p31_p1, %s29_s27), 0  ;;  %p259_p3 = pnand %p708_p0, %p258_p2 }
   0x6   : > { %p299_p4 = scmp.lt.s32.totalorder (!%p259_p3), %s832_s24, 1  ;;  %vm324_vm0 = vcmask (!%p259_p3), 261120   ;;  %vm331_vm1 = vcmask (!%p259_p3), 253952   ;;  %v796_v21 = vld [vmem:[%s993_s3] sm:$0xff] (!%p259_p3)   ;;  %v797_v22 = vld [vmem:[%s993_s3 + $0x8] sm:$0xff] (!%p259_p3)   ;;  %v800_v50 = vld [vmem:[%s995_s5 + $0x10] sm:$0xff] (!%p259_p3)  }
   0x7   : > { %262 = sbr.rel (%p259_p3) target bundleno = 807 (0x327), region = 48  ;;  %743 = vmatprep.subr.bf16.mxu0 (!%p259_p3), %v796_v21  ;;  %v711_v34 = vld [vmem:[%s991_s1] ss:$0 sm:$0xff] (!%p259_p3)  ;;  %v799_v49 = vld [vmem:[%s995_s5 + $0x8] sm:$0xff] (!%p259_p3)   ;;  %v801_v51 = vld [vmem:[%s995_s5 + $0x18] sm:$0xff] (!%p259_p3)  }
   0x8   : > { %744 = vmatpush3.bf16.msra.mxu0 (!%p259_p3), %v796_v21  ;;  %v712_v40 = vld [vmem:[%s992_s2] ss:$0 sm:$0xff] (!%p259_p3)  ;;  %v803_v53 = vld [vmem:[%s995_s5 + $0x28] sm:$0xff] (!%p259_p3)   ;;  %v804_v54 = vld [vmem:[%s995_s5 + $0x30] sm:$0xff] (!%p259_p3)  }
   0x9   : > { %745 = vmatprep.subr.bf16.mxu0 (!%p259_p3), %v797_v22  ;;  %v798_v48 = vld [vmem:[%s995_s5] sm:$0xff] (!%p259_p3)   ;;  %v805_v55 = vld [vmem:[%s995_s5 + $0x38] sm:$0xff] (!%p259_p3)  }
   0xa   : > { %751 = vmatprep.subr.bf16.mxu1 (!%p259_p3), %v798_v48  ;;  %v802_v52 = vld [vmem:[%s995_s5 + $0x20] sm:$0xff] (!%p259_p3)  }
   0xb   : > { %752 = vmatpush3.bf16.msra.mxu1 (!%p259_p3), %v798_v48  ;;  %v713_v56 = vld [vmem:[%s994_s4] ss:$0 sm:$0xff] (!%p259_p3) }
   0xc   : > { %746 = vmatpush3.bf16.msra.mxu0 (!%p259_p3), %v797_v22  ;;  %753 = vmatprep.subr.bf16.mxu1 (!%p259_p3), %v799_v49 }
   0xe   : > { %s1003_s24 = smov (!%p299_p4, %s832_s24), 1 }
   0xf   : > { %s771_s28 = smul.u32 24, %s1003_s24  ;;  %754 = vmatpush3.bf16.msra.mxu1 %v799_v49 }
  0x10   : > { %755 = vmatprep.subr.bf16.mxu1 %v800_v50 }
  0x11   : > { %s306_s8 = scalar_lea.vmem %s990_s0, %s771_s28  ;;  %s316_s21 = scalar_lea.vmem %s997_s7, %s771_s28 }
  0x12   : > { %v908_v0 = vld [vmem:[%s306_s8] sm:$0xff]  ;;  %v910_v1 = vld [vmem:[%s306_s8 + $0x10] sm:$0x1]  ;;  %v912_v2 = vld [vmem:[%s306_s8 + $0x8] sm:$0xff] }
  0x13   : > { %v325_v3 = vsel %vm324_vm0, %v908_v0, 0.0  ;;  %v332_v4 = vsel %vm331_vm1, %v910_v1, 0.0  ;;  %v328_v5 = vsel %vm324_vm0, %v912_v2, 0.0  ;;  %756 = vmatpush3.bf16.msra.mxu1 %v800_v50 }
  0x14   : > { %326 = vadd.xlane.f32.xlu0 %v325_v3  ;;  %333 = vadd.xlane.f32.xlu1 %v332_v4 }
  0x15   : > { %757 = vmatprep.subr.bf16.mxu1 %v801_v51 }
  0x17   : > { %758 = vmatpush3.bf16.msra.mxu1 %v801_v51 }
  0x18   : > { %329 = vadd.xlane.f32.xlu0 %v328_v5  ;;  %759 = vmatprep.subr.bf16.mxu1 %v802_v52 }
  0x1b   : > { %760 = vmatpush3.bf16.msra.mxu1 %v802_v52 }
  0x1c   : > { %761 = vmatprep.subr.bf16.mxu1 %v803_v53 }
  0x1f   : > { %762 = vmatpush3.bf16.msra.mxu1 %v803_v53 }
  0x20   : > { %763 = vmatprep.subr.bf16.mxu1 %v804_v54 }
  0x23   : > { %764 = vmatpush3.bf16.msra.mxu1 %v804_v54 }
  0x24   : > { %765 = vmatprep.subr.bf16.mxu1 %v805_v55 }
  0x27   : > { %766 = vmatpush3.bf16.msra.mxu1 %v805_v55 }
  0xa1   : > { %v327_v6 = vpop.xlane.xlu0 %326  ;;  %v334_v7 = vpop.xlane.xlu1 %333 }
  0xa2   : > { %v336_v8 = vmul.f32 0.03125, %v327_v6  ;;  %v338_v9 = vmul.f32 0.03125, %v334_v7 }
  0xa4   : > { %v339_v10 = vsub.f32 %v908_v0, %v336_v8  ;;  %v341_v11 = vsub.f32 %v910_v1, %v338_v9 }
  0xa5   : > { %v330_v12 = vpop.xlane.xlu0 %329 }
  0xa6   : > { %v337_v13 = vmul.f32 0.03125, %v330_v12  ;;  %v342_v14 = vmul.f32 %v339_v10, %v339_v10  ;;  %v344_v15 = vmul.f32 %v341_v11, %v341_v11 }
  0xa8   : > { %v340_v16 = vsub.f32 %v912_v2, %v337_v13  ;;  %v345_v17 = vsel %vm324_vm0, %v342_v14, 0.0  ;;  %v351_v18 = vsel %vm331_vm1, %v344_v15, 0.0 }
  0xa9   : > { %346 = vadd.xlane.f32.xlu1 %v345_v17 }
  0xaa   : > { %v343_v19 = vmul.f32 %v340_v16, %v340_v16 }
  0xac   : > { %v348_v20 = vsel %vm324_vm0, %v343_v19, 0.0 }
  0xad   : > { %352 = vadd.xlane.f32.xlu1 %v351_v18  ;;  %349 = vadd.xlane.f32.xlu0 %v348_v20 }
 0x136   : > { %v347_v23 = vpop.xlane.xlu1 %346 }
 0x137   : > { %v354_v24 = vmul.f32 0.03125, %v347_v23 }
 0x139   : > { %v357_v25 = vadd.f32 1e-06, %v354_v24 }
 0x13a   : > { %v353_v26 = vpop.xlane.xlu1 %352  ;;  %v350_v27 = vpop.xlane.xlu0 %349 }
 0x13b   : > { %806 = vrsqrt.f32 %v357_v25  ;;  %v356_v28 = vmul.f32 0.03125, %v353_v26  ;;  %v355_v29 = vmul.f32 0.03125, %v350_v27 }
 0x13d   : > { %v359_v30 = vadd.f32 1e-06, %v356_v28  ;;  %v358_v31 = vadd.f32 1e-06, %v355_v29 }
 0x13f   : > { %808 = vrsqrt.f32 %v359_v30 }
 0x140   : > { %810 = vrsqrt.f32 %v358_v31 }
 0x145   : > { %v807_v32 = vpop.eup %806 }
 0x146   : > { %v363_v33 = vmul.f32 %v807_v32, %v339_v10  ;;  %v718_v32 = vld [vmem:[%s996_s6] ss:$0 sm:$0xff] }
 0x148   : > { %v372_v39 = vmul.f32 %v711_v34, %v363_v33 }
 0x149   : > { %v809_v35 = vpop.eup %808 }
 0x14a   : > { %v811_v36 = vpop.eup %810  ;;  %v365_v37 = vmul.f32 %v809_v35, %v341_v11  ;;  %v381_v44 = vadd.f32 %v712_v40, %v372_v39 }
 0x14b   : > { %v364_v38 = vmul.f32 %v811_v36, %v340_v16 }
 0x14c   : > { %v374_v41 = vmul.f32 %v711_v34, %v365_v37 }
 0x14d   : > { %v373_v42 = vmul.f32 %v711_v34, %v364_v38 }
 0x14e   : > { %v383_v43 = vadd.f32 %v712_v40, %v374_v41 }
 0x14f   : > { %v382_v45 = vadd.f32 %v712_v40, %v373_v42 }
 0x150   : > { %v385_v46 = vpack.c.bf16 %v383_v43, %v383_v43 }
 0x151   : > { %v384_v47 = vpack.c.bf16 %v382_v45, %v381_v44 }
 0x153   : > { %747 = vmatprep.mubr.msk.bf16.mxu0 %vm324_vm0, %v384_v47 }
 0x154   : > { %748 = vmatmul.mubr.msk.bf16.vlgmr.msra.gmra.mrb[0].mxu0 %vm324_vm0, %v385_v46 }
 0x227   : > { %v749_v57 = vpop.f32.mrb[0].mxu0 }
 0x228   : > { %v458_v58 = vadd.f32 %v749_v57, %v713_v56  ;;  %v449_v59 = vpop.f32.mrb[1].mxu0 }
 0x229   : > { %v450_v60 = vadd.f32 %v713_v56, %v449_v59  ;;  %v750_v61 = vpop.f32.mrb[2].mxu0 }
 0x22a   : > { %v465_v62 = vmul.f32 %v458_v58, %v458_v58  ;;  %v452_v63 = vpop.f32.mrb[3].mxu0 }
 0x22b   : > { %v463_v3 = vmul.f32 %v450_v60, %v450_v60  ;;  %v453_v4 = vadd.f32 %v713_v56, %v452_v63 }
 0x22c   : > { %v468_v5 = vmul.f32 %v465_v62, %v458_v58 }
 0x22d   : > { %v466_v6 = vmul.f32 %v463_v3, %v450_v60  ;;  %v464_v7 = vmul.f32 %v453_v4, %v453_v4 }
 0x22e   : > { %v471_v8 = vmul.f32 0.044715, %v468_v5 }
 0x22f   : > { %v469_v9 = vmul.f32 0.044715, %v466_v6  ;;  %v467_v10 = vmul.f32 %v464_v7, %v453_v4 }
 0x230   : > { %v474_v11 = vadd.f32 %v471_v8, %v458_v58 }
 0x231   : > { %v470_v12 = vmul.f32 0.044715, %v467_v10  ;;  %v472_v13 = vadd.f32 %v469_v9, %v450_v60 }
 0x232   : > { %v477_v14 = vmul.f32 0.7978846, %v474_v11 }
 0x233   : > { %v473_v15 = vadd.f32 %v470_v12, %v453_v4  ;;  %v475_v16 = vmul.f32 0.7978846, %v472_v13 }
 0x234   : > { %812 = vtanh.f32 %v477_v14 }
 0x235   : > { %v476_v17 = vmul.f32 0.7978846, %v473_v15  ;;  %814 = vtanh.f32 %v475_v16 }
 0x237   : > { %816 = vtanh.f32 %v476_v17 }
 0x23e   : > { %v813_v18 = vpop.eup %812 }
 0x23f   : > { %v815_v19 = vpop.eup %814  ;;  %v483_v20 = vadd.f32 1.0, %v813_v18 }
 0x240   : > { %v481_v21 = vadd.f32 1.0, %v815_v19 }
 0x241   : > { %v817_v22 = vpop.eup %816  ;;  %v486_v23 = vmul.f32 0.5, %v483_v20 }
 0x242   : > { %v482_v24 = vadd.f32 1.0, %v817_v22  ;;  %v484_v25 = vmul.f32 0.5, %v481_v21 }
 0x243   : > { %v489_v27 = vmul.f32 %v486_v23, %v458_v58 }
 0x244   : > { %v485_v26 = vmul.f32 0.5, %v482_v24  ;;  %v487_v28 = vmul.f32 %v484_v25, %v450_v60 }
 0x245   : > { %v491_v31 = vpack.c.bf16 %v489_v27, %v489_v27 }
 0x246   : > { %v488_v29 = vmul.f32 %v485_v26, %v453_v4 }
 0x248   : > { %v490_v30 = vpack.c.bf16 %v488_v29, %v487_v28 }
 0x24a   : > { %767 = vmatprep.mubr.bf16.mxu1 %v490_v30 }
 0x24b   : > { %768 = vmatmul.mubr.bf16.vlgmr.msra.gmra.mrb[0].mxu1 %v491_v31 }
 0x31e   : > { %v769_v33 = vpop.f32.mrb[0].mxu1 }
 0x31f   : > { %v606_v34 = vadd.f32 %v769_v33, %v718_v32  ;;  %v597_v35 = vpop.f32.mrb[1].mxu1 }
 0x320   : > { %v598_v36 = vadd.f32 %v718_v32, %v597_v35  ;;  %v770_v37 = vpop.f32.mrb[2].mxu1 }
 0x321   : > { %v613_v38 = vadd.f32 %v606_v34, %v910_v1  ;;  %v600_v39 = vpop.f32.mrb[3].mxu1 }
 0x322   : > { %v611_v40 = vadd.f32 %v598_v36, %v908_v0  ;;  %v601_v41 = vadd.f32 %v718_v32, %v600_v39 }
 0x323   : > { %616 = vst.msk [vmem:[%s316_s21 + $0x10] sm:$0x1] %vm331_vm1, %v613_v38 }
 0x324   : > { %614 = vst.msk [vmem:[%s316_s21] sm:$0xff] %vm324_vm0, %v611_v40  ;;  %v612_v42 = vadd.f32 %v601_v41, %v912_v2 }
 0x326   : > { %615 = vst.msk [vmem:[%s316_s21 + $0x8] sm:$0xff] %vm324_vm0, %v612_v42 }
 0x327 PF: > { %s17_s26 = sadd.s32 1, %s840_s26   ;;  %s998_s24 = smov %s836_s25 }
 0x328   : > { %p14_p5 = scmp.ge.s32.totalorder %s17_s26, 4   ;;  %s999_s25 = smov %s1001_s27 }
 0x32a   :  { %16 = sbr.rel (!%p14_p5) target bundleno = 2 (0x2), region = 78 }

// kernel: dino_forward.6
= control target key start
LH: loop header
LB: loop body
LE: loop exit
PB: predicated region body
PF: predicated region fallthrough
CT: control target
= control target key end

     0   :  { %s1126_s24 = smov 0   ;;  %s1128_s25 = smov 0   ;;  %s1257_s0 = inlined_call_operand.vmem [shape: f32[2,17,32], index: 0, kind: input, shape index: {}, may-alias: {0,7}]   ;;  %s1258_s1 = inlined_call_operand.vmem [shape: f32[1,32], index: 1, kind: input, shape index: {}]   ;;  %s1259_s2 = inlined_call_operand.vmem [shape: f32[1,32], index: 2, kind: input, shape index: {}]   ;;  %s1260_s3 = inlined_call_operand.vmem [shape: bf16[4,32,24], index: 3, kind: input, shape index: {}]   ;;  %s1261_s4 = inlined_call_operand.vmem [shape: f32[4,1,24], index: 4, kind: input, shape index: {}]   ;;  %s1262_s5 = inlined_call_operand.vmem [shape: bf16[4,8,32], index: 5, kind: input, shape index: {}]   ;;  %s1263_s6 = inlined_call_operand.vmem [shape: f32[1,32], index: 6, kind: input, shape index: {}]   ;;  %s1264_s7 = inlined_call_operand.vmem [shape: f32[2,17,32], index: 7, kind: output, shape index: {}, may-alias: {0,7}]  }
   0x1   :  { %s1130_s26 = smov 0   ;;  %s1132_s27 = smov 0  }
   0x2   :  { %s1134_s28 = smov 0  }
   0x3 LB: > { %s26_s29 = sadd.s32 1, %s1073_s26  ;;  %s29_s30 = sadd.s32 1, %s1077_s27  ;;  %s1081_s28 = sphi %s1134_s28, %s17_s28   ;;  %s1077_s27 = sphi %s1132_s27, %s1270_s27   ;;  %s1073_s26 = sphi %s1130_s26, %s1269_s26   ;;  %s1069_s25 = sphi %s1128_s25, %s1268_s25   ;;  %s1065_s24 = sphi %s1126_s24, %s1267_s24  }
   0x4   : > { %p27_p0 = scmp.ge.s32.totalorder %s26_s29, 4  ;;  %p896_p1 = scmp.ge.s32.totalorder %s1081_s28, 1 }
   0x5   : > { %p276_p2 = scmp.lt.s32.totalorder %s1081_s28, 9 }
   0x6   : > { %s1272_s29 = smov (%p27_p0, %s26_s29), 0  ;;  %s1274_s30 = smov (!%p27_p0, %s29_s30), %s1077_s27 }
   0x7   : > { %p277_p3 = pnand %p896_p1, %p276_p2  ;;  %p31_p4 = scmp.ge.s32.totalorder %s1274_s30, 2 }
   0x8   : > { %p320_p5 = scmp.lt.s32.totalorder (!%p277_p3), %s1069_s25, 1  ;;  %p325_p6 = scmp.lt.s32.totalorder (!%p277_p3), %s1065_s24, 3 }
   0x9   : > { %s1276_s30 = smov (%p31_p4, %s1274_s30), 0  ;;  %280 = sbr.rel (%p277_p3) target bundleno = 1683 (0x693), region = 48 }
   0xa   : > { %1265 = sst [smem:[#allocation4_spill]] %s1276_s30  ;;  %p902_p7 = scmp.ne.s32.totalorder (!%p277_p3), %s1065_s24, 0 }
  0x10   : > { %s1278_s25 = smov (!%p320_p5, %s1069_s25), 1  ;;  %346 = sbr.rel (%p902_p7) target bundleno = 343 (0x157), region = 52 }
  0x11   : > { %s1160_s8 = scalar_select %p325_p6, %s1065_s24, 3 }
  0x12   : > { %s977_s9 = smul.u32 24, %s1278_s25  ;;  %vm359_vm0 = vcmask (!%p902_p7), 253952   ;;  %v908_v3 = vld [vmem:[%s1263_s6] ss:$0 sm:$0xff] (!%p902_p7)  ;;  %vm352_vm1 = vcmask (!%p902_p7), 261120   ;;  %vm425_vm4 = vcmask (!%p902_p7), 257024  }
  0x13   : > { %s925_s10 = sshll.u32 %s1160_s8, 4  ;;  %s332_s13 = scalar_lea.vmem %s1261_s4, %s1160_s8  ;;  %v903_v35 = vld [vmem:[%s1258_s1] ss:$0 sm:$0xff] (!%p902_p7)  ;;  %vm429_vm2 = vsmask.f32 (!%p902_p7), 256 }
  0x14   : > { %s324_s16 = scalar_lea.vmem %s1257_s0, %s977_s9  ;;  %s1173_s19 = scalar_lea.vmem %s1260_s3, %s925_s10  ;;  %v904_v37 = vld [vmem:[%s1259_s2] ss:$0 sm:$0xff] (!%p902_p7)  ;;  %vm430_vm3 = vmand (!%p902_p7), %vm359_vm0, %vm429_vm2  ;;  %v431_v43 = vld [vmem:[#allocation2 + $0x8] sm:$0x1] (!%p902_p7) }
  0x15   : > { %s900_s20 = sshll.u32 %s1160_s8, 2  ;;  %s1179_s23 = scalar_lea.vmem %s1264_s7, %s977_s9  ;;  %v349_v0 = vld [vmem:[%s324_s16 + $0x10] sm:$0x1] (!%p902_p7)  ;;  %v348_v1 = vld [vmem:[%s324_s16 + $0x8] sm:$0xff] (!%p902_p7)  ;;  %v347_v4 = vld [vmem:[%s324_s16] sm:$0xff] (!%p902_p7) }
  0x16   : > { %s1184_s11 = scalar_lea.vmem %s1262_s5, %s900_s20  ;;  %v360_v2 = vsel (!%p902_p7), %vm359_vm0, %v349_v0, 0.0  ;;  %v443_v5 = vadd.f32 (!%p902_p7), %v908_v3, %v349_v0  ;;  %v356_v6 = vsel (!%p902_p7), %vm352_vm1, %v348_v1, 0.0  ;;  %v442_v7 = vadd.f32 (!%p902_p7), %v908_v3, %v348_v1 }
  0x17   : > { %361 = vadd.xlane.f32.xlu0 %v360_v2  ;;  %357 = vadd.xlane.f32.xlu1 %v356_v6  ;;  %v353_v8 = vsel %vm352_vm1, %v347_v4, 0.0  ;;  %v441_v9 = vadd.f32 %v908_v3, %v347_v4 }
  0x18   : > { %446 = vst.msk [vmem:[#allocation3 + $0x10] sm:$0x1] %vm359_vm0, %v443_v5 }
  0x19   : > { %445 = vst.msk [vmem:[#allocation3 + $0x8] sm:$0xff] %vm352_vm1, %v442_v7  ;;  %444 = vst.msk [vmem:[#allocation3] sm:$0xff] %vm352_vm1, %v441_v9 }
  0x1b   : > { %354 = vadd.xlane.f32.xlu0 %v353_v8 }
  0xa4   : > { %v362_v10 = vpop.xlane.xlu0 %361  ;;  %v358_v12 = vpop.xlane.xlu1 %357 }
  0xa5   : > { %v366_v11 = vmul.f32 0.03125, %v362_v10  ;;  %v365_v13 = vmul.f32 0.03125, %v358_v12 }
  0xa7   : > { %v369_v14 = vsub.f32 %v349_v0, %v366_v11  ;;  %v368_v15 = vsub.f32 %v348_v1, %v365_v13 }
  0xa8   : > { %v355_v16 = vpop.xlane.xlu0 %354 }
  0xa9   : > { %v364_v17 = vmul.f32 0.03125, %v355_v16  ;;  %v372_v18 = vmul.f32 %v369_v14, %v369_v14  ;;  %v371_v19 = vmul.f32 %v368_v15, %v368_v15 }
  0xab   : > { %v367_v20 = vsub.f32 %v347_v4, %v364_v17  ;;  %v379_v21 = vsel %vm359_vm0, %v372_v18, 0.0  ;;  %v376_v22 = vsel %vm352_vm1, %v371_v19, 0.0 }
  0xac   : > { %380 = vadd.xlane.f32.xlu1 %v379_v21 }
  0xad   : > { %v370_v23 = vmul.f32 %v367_v20, %v367_v20 }
  0xaf   : > { %v373_v24 = vsel %vm352_vm1, %v370_v23, 0.0 }
  0xb0   : > { %377 = vadd.xlane.f32.xlu1 %v376_v22  ;;  %374 = vadd.xlane.f32.xlu0 %v373_v24 }
 0x139   : > { %v381_v25 = vpop.xlane.xlu1 %380 }
 0x13a   : > { %v384_v26 = vmul.f32 0.03125, %v381_v25 }
 0x13c   : > { %v387_v27 = vadd.f32 1e-06, %v384_v26 }
 0x13d   : > { %v378_v28 = vpop.xlane.xlu1 %377  ;;  %v375_v29 = vpop.xlane.xlu0 %374 }
 0x13e   : > { %1021 = vrsqrt.f32 %v387_v27  ;;  %v383_v30 = vmul.f32 0.03125, %v378_v28  ;;  %v382_v31 = vmul.f32 0.03125, %v375_v29 }
 0x140   : > { %v386_v32 = vadd.f32 1e-06, %v383_v30  ;;  %v385_v33 = vadd.f32 1e-06, %v382_v31 }
 0x142   : > { %1023 = vrsqrt.f32 %v386_v32 }
 0x143   : > { %1025 = vrsqrt.f32 %v385_v33 }
 0x148   : > { %v1022_v34 = vpop.eup %1021 }
 0x149   : > { %v393_v36 = vmul.f32 %v1022_v34, %v369_v14 }
 0x14b   : > { %v402_v38 = vmul.f32 %v903_v35, %v393_v36 }
 0x14c   : > { %v1024_v39 = vpop.eup %1023 }
 0x14d   : > { %v1026_v40 = vpop.eup %1025  ;;  %v411_v41 = vadd.f32 %v904_v37, %v402_v38  ;;  %v392_v42 = vmul.f32 %v1024_v39, %v368_v15 }
 0x14e   : > { %v391_v44 = vmul.f32 %v1026_v40, %v367_v20 }
 0x14f   : > { %v928_v45 = vpack.c.bf16 %v411_v41, %v411_v41  ;;  %v401_v46 = vmul.f32 %v903_v35, %v392_v42 }
 0x150   : > { %v400_v47 = vmul.f32 %v903_v35, %v391_v44 }
 0x151   : > { %v432_v48 = vsel %vm430_vm3, %v928_v45, %v431_v43  ;;  %v410_v49 = vadd.f32 %v904_v37, %v401_v46 }
 0x152   : > { %433 = vst [vmem:[#allocation2 + $0x8] sm:$0x1] %v432_v48  ;;  %v409_v50 = vadd.f32 %v904_v37, %v400_v47 }
 0x153   : > { %v927_v51 = vpack.c.bf16 %v410_v49, %v410_v49 }
 0x154   : > { %v926_v52 = vpack.c.bf16 %v409_v50, %v409_v50 }
 0x155   : > { %427 = vst.msk [vmem:[#allocation2 + $0x4] sm:$0xf] %vm425_vm4, %v927_v51 }
 0x156   : > { %426 = vst.msk [vmem:[#allocation2] sm:$0xf] %vm425_vm4, %v926_v52 }
 0x157 PF: > { %v1027_v53 = vld [vmem:[%s1173_s19] sm:$0xff]   ;;  %v1028_v54 = vld [vmem:[%s1173_s19 + $0x8] sm:$0xff]   ;;  %vm481_vm5 = vcmask 261120   ;;  %vm549_vm6 = vcmask 64512   ;;  %s1083_s18 = smov 120   ;;  %vm617_vm7 = vcmask 131072  }
 0x158   : > { %944 = vmatprep.subr.bf16.mxu0 %v1027_v53  ;;  %v909_v57 = vld [vmem:[%s332_s13] ss:$0 sm:$0xff]  ;;  %vm610_vm8 = vcmask 138240   ;;  %s1084_s8 = smov 112   ;;  %vm658_vm9 = vcmask 1040384   ;;  %v1085_v38 = vmov 0  }
 0x159   : > { %945 = vmatpush3.bf16.msra.mxu0 %v1027_v53  ;;  %v1030_v56 = vld [vmem:[#allocation2 + $0x8] ss:$0 sps:$4 sm:$0x11]   ;;  %v660_v39 = vsel %vm658_vm9, 65535, %v1085_v38  ;;  %v717_v42 = vld [vmem:[%s1184_s11] sm:$0xf] }
 0x15a   : > { %946 = vmatprep.subr.bf16.mxu0 %v1028_v54  ;;  %vm724_vm10 = vcmask 1043456   ;;  %vm781_vm11 = vcmask 253952   ;;  %p922_p8 = scmp.ne.s32.totalorder %s1065_s24, 3 }
 0x15b   : > { %v726_v51 = vsel %vm724_vm10, %v717_v42, 0 }
 0x15d   : > { %v1029_v55 = vld [vmem:[#allocation2] sm:$0xff]   ;;  %947 = vmatpush3.bf16.msra.mxu0 %v1028_v54 }
 0x15e   : > { %948 = vmatprep.mubr.msk.bf16.mxu0 %vm481_vm5, %v1029_v55 }
 0x160   : > { %949 = vmatmul.mubr.msk.bf16.vlgmr.msra.gmra.mrb[0].mxu0 %vm481_vm5, %v1030_v56 }
 0x233   : > { %v950_v58 = vpop.f32.mrb[0].mxu0 }
 0x234   : > { %v522_v59 = vpop.f32.mrb[1].mxu0  ;;  %v531_v0 = vadd.f32 %v950_v58, %v909_v57  ;;  %v714_v58 = vld [vmem:[#allocation3 + $0x10] sm:$0x1] }
 0x235   : > { %v523_v60 = vadd.f32 %v909_v57, %v522_v59  ;;  %v951_v61 = vpop.f32.mrb[2].mxu0  ;;  %v712_v59 = vld [vmem:[#allocation3] sm:$0xff] }
 0x236   : > { %v525_v62 = vpop.f32.mrb[3].mxu0  ;;  %v542_v5 = vpack.c.bf16 %v531_v0, %v531_v0  ;;  %v538_v10 = vmul.f32 0.35355338, %v531_v0 }
 0x237   : > { %v526_v63 = vadd.f32 %v909_v57, %v525_v62  ;;  %v536_v1 = vmul.f32 0.35355338, %v523_v60 }
 0x238   : > { %v540_v11 = vpack.c.bf16 %v538_v10, %v538_v10 }
 0x239   : > { %v537_v2 = vmul.f32 0.35355338, %v526_v63  ;;  %v541_v3 = vpack.c.bf16 %v526_v63, %v523_v60  ;;  %v713_v63 = vld [vmem:[#allocation3 + $0x8] sm:$0xff] }
 0x23b   : > { %545 = vrot.lane.b32.xlu0 %v541_v3, %s1083_s18  ;;  %v539_v4 = vpack.c.bf16 %v537_v2, %v536_v1 }
 0x23d   : > { %956 = vmatprep.mubr.msk.bf16.mxu1 %vm549_vm6, %v539_v4 }
 0x23f   : > { %547 = vrot.lane.b32.xlu0 %v542_v5, %s1083_s18 }
 0x2ad   : > { %v546_v6 = vpop.permute.xlu0 %545 }
 0x2ae   : > { %974 = vmatprep.subr.msk.bf16.mxu1 %vm549_vm6, %v546_v6  ;;  %v557_v7 = vsel %vm549_vm6, %v546_v6, 0 }
 0x2af   : > { %953 = vmatpush3.bf16.xpose.msra.mxu1 %v557_v7 }
 0x2b1   : > { %v548_v8 = vpop.permute.xlu0 %547 }
 0x2b2   : > { %975 = vmatprep.subr.msk.bf16.mxu1 %vm549_vm6, %v548_v8  ;;  %v560_v9 = vsel %vm549_vm6, %v548_v8, 0 }
 0x2b7   : > { %955 = vmatpush3.bf16.xpose.msra.mxu1 %v560_v9 }
 0x2be   : > { %957 = vmatmul.mubr.msk.bf16.vlgmr.msra.gmra.mrb[0].mxu1 %vm549_vm6, %v540_v11 }
 0x391   : > { %v958_v12 = vpop.f32.mrb[0].mxu1 }
 0x392   : > { %v596_v13 = vpop.f32.mrb[1].mxu1  ;;  %v618_v14 = vsel %vm617_vm7, %v958_v12, -inf }
 0x393   : > { %619 = vmax.xlane.f32.xlu0 %v618_v14  ;;  %v959_v15 = vpop.f32.mrb[2].mxu1  ;;  %v611_v16 = vsel %vm610_vm8, %v596_v13, -inf }
 0x394   : > { %612 = vmax.xlane.f32.xlu1 %v611_v16  ;;  %v599_v17 = vpop.f32.mrb[3].mxu1 }
 0x395   : > { %v614_v18 = vsel %vm610_vm8, %v599_v17, -inf }
 0x398   : > { %615 = vmax.xlane.f32.xlu1 %v614_v18 }
 0x3a9   : > { %647 = vrot.lane.b32.xlu1 %v541_v3, %s1084_s8 }
 0x420   : > { %v620_v19 = vpop.xlane.xlu0 %619 }
 0x421   : > { %v623_v20 = vsub.f32 %v958_v12, %v620_v19  ;;  %v613_v21 = vpop.xlane.xlu1 %612 }
 0x422   : > { %v621_v22 = vsub.f32 %v596_v13, %v613_v21 }
 0x423   : > { %v628_v23 = vmul.f32 1.442695, %v623_v20 }
 0x424   : > { %v624_v24 = vmul.f32 1.442695, %v621_v22 }
 0x425   : > { %1031 = vpow2.f32 %v628_v23  ;;  %v616_v25 = vpop.xlane.xlu1 %615 }
 0x426   : > { %v622_v26 = vsub.f32 %v599_v17, %v616_v25  ;;  %1033 = vpow2.f32 %v624_v24 }
 0x428   : > { %v626_v27 = vmul.f32 1.442695, %v622_v26 }
 0x429   : > { %v648_v28 = vpop.permute.xlu1 %647 }
 0x42a   : > { %960 = vmatprep.subr.bf16.mxu0 %v648_v28  ;;  %1035 = vpow2.f32 %v626_v27 }
 0x42b   : > { %961 = vmatpush3.bf16.msra.mxu0 %v648_v28 }
 0x42f   : > { %v1032_v29 = vpop.eup %1031 }
 0x430   : > { %v636_v30 = vsel %vm617_vm7, %v1032_v29, 0.0  ;;  %v1034_v31 = vpop.eup %1033 }
 0x431   : > { %637 = vadd.xlane.f32.xlu1 %v636_v30  ;;  %v630_v32 = vsel %vm610_vm8, %v1034_v31, 0.0 }
 0x434   : > { %v1036_v33 = vpop.eup %1035 }
 0x435   : > { %631 = vadd.xlane.f32.xlu1 %v630_v32  ;;  %v633_v34 = vsel %vm610_vm8, %v1036_v33, 0.0 }
 0x439   : > { %634 = vadd.xlane.f32.xlu1 %v633_v34 }
 0x44a   : > { %649 = vrot.lane.b32.xlu1 %v542_v5, %s1084_s8 }
 0x4be   : > { %v638_v35 = vpop.xlane.xlu1 %637 }
 0x4bf   : > { %1037 = vrcp.f32 %v638_v35 }
 0x4c2   : > { %v632_v36 = vpop.xlane.xlu1 %631 }
 0x4c3   : > { %1039 = vrcp.f32 %v632_v36 }
 0x4c6   : > { %v635_v37 = vpop.xlane.xlu1 %634 }
 0x4c7   : > { %1041 = vrcp.f32 %v635_v37 }
 0x4c9   : > { %v1038_v43 = vpop.eup %1037 }
 0x4ca   : > { %v650_v40 = vpop.permute.xlu1 %649  ;;  %v644_v46 = vmul.f32 %v1038_v43, %v1032_v29 }
 0x4cb   : > { %v662_v41 = vand.u32 %v660_v39, %v650_v40 }
 0x4cc   : > { %v646_v50 = vpack.c.bf16 %v644_v46, %v644_v46 }
 0x4cd   : > { %962 = vmatprep.subr.bf16.mxu0 %v662_v41  ;;  %v1040_v44 = vpop.eup %1039 }
 0x4ce   : > { %963 = vmatpush3.bf16.msra.mxu0 %v662_v41  ;;  %v642_v47 = vmul.f32 %v1040_v44, %v1034_v31 }
 0x4cf   : > { %976 = vmatprep.subr.msk.bf16.mxu0 %vm724_vm10, %v717_v42 }
 0x4d1   : > { %v1042_v45 = vpop.eup %1041 }
 0x4d2   : > { %v643_v48 = vmul.f32 %v1042_v45, %v1036_v33 }
 0x4d4   : > { %v645_v49 = vpack.c.bf16 %v643_v48, %v642_v47 }
 0x4d6   : > { %964 = vmatprep.mubr.msk.bf16.mxu0 %vm610_vm8, %v645_v49 }
 0x4d7   : > { %965 = vmatmul.mubr.msk.bf16.vlgmr.msra.gmra.mrb[4].mxu0 %vm610_vm8, %v646_v50 }
 0x4d8   : > { %969 = vmatpush3.bf16.msra.mxu0 %v726_v51 }
 0x5aa   : > { %v966_v52 = vpop.f32.mrb[4].mxu0 }
 0x5ab   : > { %v698_v53 = vpop.f32.mrb[5].mxu0  ;;  %v716_v57 = vpack.c.bf16 %v966_v52, %v966_v52 }
 0x5ac   : > { %v967_v54 = vpop.f32.mrb[6].mxu0 }
 0x5ad   : > { %v701_v55 = vpop.f32.mrb[7].mxu0 }
 0x5ae   : > { %v715_v56 = vpack.c.bf16 %v701_v55, %v698_v53 }
 0x5b0   : > { %970 = vmatprep.mubr.msk.bf16.mxu0 %vm549_vm6, %v715_v56 }
 0x5b1   : > { %971 = vmatmul.mubr.msk.bf16.vlgmr.msra.gmra.mrb[8].mxu0 %vm549_vm6, %v716_v57 }
 0x684   : > { %v972_v60 = vpop.f32.mrb[8].mxu0  ;;  %786 = sbr.rel (%p922_p8) target bundleno = 1683 (0x693), region = 56 }
 0x685   : > { %v778_v61 = vadd.f32 %v972_v60, %v714_v58  ;;  %v762_v62 = vpop.f32.mrb[9].mxu0 }
 0x686   : > { %v776_v0 = vadd.f32 %v762_v62, %v712_v59  ;;  %v973_v1 = vpop.f32.mrb[10].mxu0 }
 0x687   : > { %782 = vst.msk [vmem:[#allocation3 + $0x10] sm:$0x1] %vm781_vm11, %v778_v61  ;;  %v765_v2 = vpop.f32.mrb[11].mxu0 }
 0x688   : > { %779 = vst.msk [vmem:[#allocation3] sm:$0xff] %vm481_vm5, %v776_v0  ;;  %v777_v3 = vadd.f32 %v765_v2, %v713_v63 }
 0x68a   : > { %780 = vst.msk [vmem:[#allocation3 + $0x8] sm:$0xff] %vm481_vm5, %v777_v3 }
 0x68e   : > { %v789_v6 = vld [vmem:[#allocation3 + $0x10] sm:$0x1] }
 0x68f   : > { %v787_v4 = vld [vmem:[#allocation3] sm:$0xff]  ;;  %792 = vst.msk [vmem:[%s1179_s23 + $0x10] sm:$0x1] %vm781_vm11, %v789_v6 }
 0x690   : > { %790 = vst.msk [vmem:[%s1179_s23] sm:$0xff] %vm481_vm5, %v787_v4 }
 0x691   : > { %v788_v5 = vld [vmem:[#allocation3 + $0x8] sm:$0xff] }
 0x692   : > { %791 = vst.msk [vmem:[%s1179_s23 + $0x8] sm:$0xff] %vm481_vm5, %v788_v5 }
 0x693 PF: > { %s17_s28 = sadd.s32 1, %s1081_s28   ;;  %s1266_s13 = sld [smem:[#allocation4_spill]] }
 0x694   : > { %p14_p9 = scmp.ge.s32.totalorder %s17_s28, 10   ;;  %s1267_s24 = smov %s1073_s26 }
 0x695   : > { %s1268_s25 = smov %s1077_s27  ;;  %s1269_s26 = smov %s1272_s29 }
 0x696   :  { %16 = sbr.rel (!%p14_p9) target bundleno = 3 (0x3), region = 95 }
 0x699   : > { %s1270_s27 = smov %s1266_s13 }

</bundles_post_ra>
